<compile_context>
chip_gen: v7x
topology: tpu7x:2x2x1
jax: 0.10.0
libtpu: 0.0.40
codegen_flags: <defaults>
</compile_context>

<pallas_src>
import functools
import math

import jax
import jax.numpy as jnp
from jax.experimental import pallas as pl
from jax.experimental.pallas import tpu as pltpu


# ---------------------------------------------------------------------------
# Kernels
# ---------------------------------------------------------------------------

def _layernorm_affine_kernel(x_ref, w_ref, b_ref, o_ref, *, feat_dim: int, eps: float):
    """Per-row normalize along D (unbiased variance), then y = w*y + b."""
    x = x_ref[...].astype(jnp.float32)                      # (TB, D)
    # Independent lane reductions (one pass): sum and sum-of-squares.
    s = jnp.sum(x, axis=1, keepdims=True)                   # (TB, 1)
    sq = jnp.sum(x * x, axis=1, keepdims=True)              # (TB, 1)
    mean = s * jnp.float32(1.0 / feat_dim)
    # Unbiased variance (torch.var default): divide by (D - 1).
    var = (sq - s * mean) * jnp.float32(1.0 / max(feat_dim - 1, 1))
    inv_std = jax.lax.rsqrt(var + jnp.float32(eps))          # EUP
    w = w_ref[...].astype(jnp.float32)                       # (1, D)
    b = b_ref[...].astype(jnp.float32)                       # (1, D)
    o_ref[...] = ((x - mean) * (inv_std * w) + b).astype(o_ref.dtype)


def _layernorm_kernel(x_ref, o_ref, *, feat_dim: int, eps: float):
    """Same, no affine (learnable=False): no weight/bias DMA streams at all."""
    x = x_ref[...].astype(jnp.float32)
    s = jnp.sum(x, axis=1, keepdims=True)
    sq = jnp.sum(x * x, axis=1, keepdims=True)
    mean = s * jnp.float32(1.0 / feat_dim)
    var = (sq - s * mean) * jnp.float32(1.0 / max(feat_dim - 1, 1))
    inv_std = jax.lax.rsqrt(var + jnp.float32(eps))
    o_ref[...] = ((x - mean) * inv_std).astype(o_ref.dtype)


# ---------------------------------------------------------------------------
# Wrapper
# ---------------------------------------------------------------------------

_MIN_LANE_DIM = 128                   # below this: masked vst + per-step overhead dominate
_TARGET_BUF_BYTES = 2 * 1024 * 1024   # per pipelined buffer; 2 in + 2 out bufs ~= 8 MiB total,
                                      # safe under v5e's 16 MiB default scoped VMEM (and v7x's 32 MiB)
_MAX_TB_ROWS = 1024                   # diminishing returns past ~512-1024 rows (mem-bound)


def _choose_batch_tile(batch: int, feat_dim: int, itemsize: int):
    """Largest batch-tile (packed-sublane multiple) whose buffer fits the VMEM budget."""
    row_multiple = max(8, 32 // itemsize)      # 8 rows f32, 16 bf16, 32 int8/fp8
    bytes_per_row = max(feat_dim * itemsize, 1)
    tb = _TARGET_BUF_BYTES // bytes_per_row
    tb = (tb // row_multiple) * row_multiple
    tb = min(tb, _MAX_TB_ROWS)
    if tb <= 0:
        return None                            # even a minimum-height tile blows the budget
    if tb >= batch:
        return batch                           # single block (block == full dim is legal)
    return tb


def _jnp_layer_norm(x2d, weights, biases, epsilon, learnable):
    """Plain-XLA fallback for lane-narrow (D < 128) or VMEM-overflowing D."""
    xf = x2d.astype(jnp.float32)
    mean = jnp.mean(xf, axis=1, keepdims=True)
    var = jnp.var(xf, axis=1, keepdims=True, ddof=1)   # unbiased, like torch.var
    y = (xf - mean) * jax.lax.rsqrt(var + jnp.float32(epsilon))
    if learnable:
        y = (weights.reshape(1, -1).astype(jnp.float32) * y
             + biases.reshape(1, -1).astype(jnp.float32))
    return y.astype(x2d.dtype)


def layer_norm(x: jax.Array,
               weights: jax.Array = None,
               biases: jax.Array = None,
               epsilon: float = 1e-6,
               learnable: bool = True) -> jax.Array:
    """Pallas LayerNorm matching the PyTorch module's forward()."""
    orig_shape = x.shape
    batch = orig_shape[0]
    feat_dim = int(math.prod(orig_shape[1:])) if len(orig_shape) > 1 else 1
    x2d = x.reshape(batch, feat_dim)
    itemsize = x2d.dtype.itemsize

    tb = _choose_batch_tile(batch, feat_dim, itemsize)
    if feat_dim < _MIN_LANE_DIM or tb is None:
        # Lane axis too narrow for dense stores, or a single row-tile over-fills VMEM.
        # TODO(synk): add a D-split two-pass Pallas kernel (running sum/sumsq VMEM
        # accumulators with pl.when init/finalize) for extremely wide feat_dim.
        return _jnp_layer_norm(x2d, weights, biases, epsilon, learnable).reshape(orig_shape)

    grid = (pl.cdiv(batch, tb),)
    x_spec = pl.BlockSpec((tb, feat_dim), lambda i: (i, 0))
    out_spec = pl.BlockSpec((tb, feat_dim), lambda i: (i, 0))
    # Rows are fully independent -> "parallel" lets v7x shard the grid across both TCs.
    compiler_params = pltpu.CompilerParams(dimension_semantics=("parallel",))

    if learnable:
        w2d = weights.reshape(1, feat_dim)
        b2d = biases.reshape(1, feat_dim)
        kernel = functools.partial(_layernorm_affine_kernel, feat_dim=feat_dim, eps=epsilon)
        out2d = pl.pallas_call(
            kernel,
            out_shape=jax.ShapeDtypeStruct((batch, feat_dim), x2d.dtype),
            grid_spec=pltpu.PrefetchScalarGridSpec(
                num_scalar_prefetch=0,
                grid=grid,
                in_specs=[
                    x_spec,
                    pl.BlockSpec((1, feat_dim), lambda i: (0, 0)),   # resident weights row
                    pl.BlockSpec((1, feat_dim), lambda i: (0, 0)),   # resident biases row
                ],
                out_specs=out_spec),
            compiler_params=compiler_params,
        )(x2d, w2d, b2d)
    else:
        kernel = functools.partial(_layernorm_kernel, feat_dim=feat_dim, eps=epsilon)
        out2d = pl.pallas_call(
            kernel,
            out_shape=jax.ShapeDtypeStruct((batch, feat_dim), x2d.dtype),
            grid_spec=pltpu.PrefetchScalarGridSpec(
                num_scalar_prefetch=0,
                grid=grid,
                in_specs=[x_spec],
                out_specs=out_spec),
            compiler_params=compiler_params,
        )(x2d)

    return out2d.reshape(orig_shape)


# ---------------------------------------------------------------------------
# Reference + demo
# ---------------------------------------------------------------------------

def _reference_layer_norm(x, weights, biases, epsilon=1e-6, learnable=True):
    orig_shape = x.shape
    x2d = x.reshape(orig_shape[0], -1).astype(jnp.float32)
    mean = jnp.mean(x2d, axis=1, keepdims=True)
    var = jnp.var(x2d, axis=1, keepdims=True, ddof=1)   # unbiased like torch.var
    y = (x2d - mean) / jnp.sqrt(var + epsilon)
    if learnable:
        y = (weights.reshape(1, -1).astype(jnp.float32) * y
             + biases.reshape(1, -1).astype(jnp.float32))
    return y.reshape(orig_shape).astype(x.dtype)


if __name__ == "__main__":
    epsilon = 1e-6
    key = jax.random.PRNGKey(0)
    k_x, k_w, k_b, k_small = jax.random.split(key, 4)

    # --- Pallas path: LayerNorm(input_size=128); x (8, 4, 32) flattens to D=128 ---
    input_size = 128
    x = jax.random.normal(k_x, (8, 4, 32), dtype=jnp.float32)
    # Module init is weights=1, biases=0; use non-trivial params so the affine is exercised.
    weights = 1.0 + 0.1 * jax.random.normal(k_w, (1, input_size), dtype=jnp.float32)
    biases = 0.1 * jax.random.normal(k_b, (1, input_size), dtype=jnp.float32)

    out = layer_norm(x, weights, biases, epsilon=epsilon, learnable=True)
    out = jax.block_until_ready(out)
    ref = _reference_layer_norm(x, weights, biases, epsilon=epsilon, learnable=True)
    assert out.shape == x.shape and out.dtype == x.dtype
    assert jnp.allclose(out, ref, atol=2e-5, rtol=1e-5), "learnable path mismatch vs reference"

    # --- Pallas path, learnable=False (no affine streams) ---
    out_na = layer_norm(x, epsilon=epsilon, learnable=False)
    out_na = jax.block_until_ready(out_na)
    ref_na = _reference_layer_norm(x, weights, biases, epsilon=epsilon, learnable=False)
    assert jnp.allclose(out_na, ref_na, atol=2e-5, rtol=1e-5), "non-learnable path mismatch"

    # --- Narrow-D fallback path (input_size=32 < 128): plain-jnp branch of the wrapper ---
    x_small = jax.random.normal(k_small, (2, 4, 8), dtype=jnp.float32)
    w_small = jnp.ones((1, 32), jnp.float32)
    b_small = jnp.zeros((1, 32), jnp.float32)
    out_small = jax.block_until_ready(
        layer_norm(x_small, w_small, b_small, epsilon=epsilon, learnable=True))
    ref_small = _reference_layer_norm(x_small, w_small, b_small, epsilon=epsilon, learnable=True)
    assert jnp.allclose(out_small, ref_small, atol=2e-5, rtol=1e-5), "fallback path mismatch"

    print("KERNEL_OK")
</pallas_src>

<mosaic_0001>
module attributes {stable_mosaic.version = 11 : i64} {
  func.func @_layernorm_affine_kernel(%arg0: i32, %arg1: memref<8x128xf32, #tpu.memory_space<vmem>>, %arg2: memref<1x128xf32, #tpu.memory_space<vmem>>, %arg3: memref<1x128xf32, #tpu.memory_space<vmem>>, %arg4: memref<8x128xf32, #tpu.memory_space<vmem>>) attributes {dimension_semantics = [#tpu.dimension_semantics<parallel>], iteration_bounds = array<i64: 1>, scalar_prefetch = 0 : i64, scratch_operands = 0 : i64, tpu.core_type = #tpu.core_type<tc>, window_params = [{transform_indices = @transform_0, window_bounds = array<i64: 8, 128>}, {pipeline_mode = #tpu.pipeline_mode<synchronous>, transform_indices = @transform_1, window_bounds = array<i64: 1, 128>}, {pipeline_mode = #tpu.pipeline_mode<synchronous>, transform_indices = @transform_2, window_bounds = array<i64: 1, 128>}, {transform_indices = @transform_3, window_bounds = array<i64: 8, 128>}]} {
    %c0 = arith.constant 0 : index
    %c0_0 = arith.constant 0 : index
    %0 = vector.load %arg1[%c0, %c0_0] : memref<8x128xf32, #tpu.memory_space<vmem>>, vector<8x128xf32>
    %cst = arith.constant dense<0.000000e+00> : vector<8xf32>
    %1 = vector.multi_reduction <add>, %0, %cst [1] : vector<8x128xf32> to vector<8xf32>
    %2 = vector.shape_cast %1 : vector<8xf32> to vector<8x1xf32>
    %3 = arith.mulf %0, %0 : vector<8x128xf32>
    %cst_1 = arith.constant dense<0.000000e+00> : vector<8xf32>
    %4 = vector.multi_reduction <add>, %3, %cst_1 [1] : vector<8x128xf32> to vector<8xf32>
    %5 = vector.shape_cast %4 : vector<8xf32> to vector<8x1xf32>
    %cst_2 = arith.constant 7.812500e-03 : f32
    %6 = vector.broadcast %cst_2 : f32 to vector<8x1xf32>
    %7 = arith.mulf %2, %6 : vector<8x1xf32>
    %8 = arith.mulf %2, %7 : vector<8x1xf32>
    %9 = arith.subf %5, %8 : vector<8x1xf32>
    %cst_3 = arith.constant 0.00787401571 : f32
    %10 = vector.broadcast %cst_3 : f32 to vector<8x1xf32>
    %11 = arith.mulf %9, %10 : vector<8x1xf32>
    %cst_4 = arith.constant 9.99999997E-7 : f32
    %12 = vector.broadcast %cst_4 : f32 to vector<8x1xf32>
    %13 = arith.addf %11, %12 : vector<8x1xf32>
    %14 = math.rsqrt %13 : vector<8x1xf32>
    %c0_5 = arith.constant 0 : index
    %c0_6 = arith.constant 0 : index
    %15 = vector.load %arg2[%c0_5, %c0_6] : memref<1x128xf32, #tpu.memory_space<vmem>>, vector<1x128xf32>
    %c0_7 = arith.constant 0 : index
    %c0_8 = arith.constant 0 : index
    %16 = vector.load %arg3[%c0_7, %c0_8] : memref<1x128xf32, #tpu.memory_space<vmem>>, vector<1x128xf32>
    %17 = vector.broadcast %7 : vector<8x1xf32> to vector<8x128xf32>
    %18 = arith.subf %0, %17 : vector<8x128xf32>
    %19 = vector.broadcast %14 : vector<8x1xf32> to vector<8x128xf32>
    %20 = vector.broadcast %15 : vector<1x128xf32> to vector<8x128xf32>
    %21 = arith.mulf %19, %20 : vector<8x128xf32>
    %22 = arith.mulf %18, %21 : vector<8x128xf32>
    %23 = vector.broadcast %16 : vector<1x128xf32> to vector<8x128xf32>
    %24 = arith.addf %22, %23 : vector<8x128xf32>
    %c0_9 = arith.constant 0 : index
    %c0_10 = arith.constant 0 : index
    %25 = vector.load %arg4[%c0_9, %c0_10] : memref<8x128xf32, #tpu.memory_space<vmem>>, vector<8x128xf32>
    tpu.vector_store %arg4[%c0_9, %c0_10], %24 {strides = array<i32>} : memref<8x128xf32, #tpu.memory_space<vmem>>, vector<8x128xf32>,
    return
  }
  func.func @transform_0(%arg0: i32) -> (i32, i32) {
    %c0_i32 = arith.constant 0 : i32
    %c0_i32_0 = arith.constant 0 : i32
    return %arg0, %c0_i32 : i32, i32
  }
  func.func @transform_1(%arg0: i32) -> (i32, i32) {
    %c0_i32 = arith.constant 0 : i32
    %c0_i32_0 = arith.constant 0 : i32
    %c0_i32_1 = arith.constant 0 : i32
    return %c0_i32, %c0_i32_0 : i32, i32
  }
  func.func @transform_2(%arg0: i32) -> (i32, i32) {
    %c0_i32 = arith.constant 0 : i32
    %c0_i32_0 = arith.constant 0 : i32
    %c0_i32_1 = arith.constant 0 : i32
    return %c0_i32, %c0_i32_0 : i32, i32
  }
  func.func @transform_3(%arg0: i32) -> (i32, i32) {
    %c0_i32 = arith.constant 0 : i32
    %c0_i32_0 = arith.constant 0 : i32
    return %arg0, %c0_i32 : i32, i32
  }
}

</mosaic_0001>

<bundles_post_ra>
// kernel: tpu_custom_call.1
= control target key start
LH: loop header
LB: loop body
LE: loop exit
PB: predicated region body
PF: predicated region fallthrough
CT: control target
= control target key end

     0   :  { %8 = vsyncpa [#allocation3], 0  ;;  %s179_s0 = inlined_call_operand.hbm [shape: f32[8,128], index: 0, kind: input, shape index: {}]   ;;  %s180_s1 = inlined_call_operand.vmem [shape: f32[1,128], index: 1, kind: input, shape index: {}]   ;;  %s181_s2 = inlined_call_operand.vmem [shape: f32[1,128], index: 2, kind: input, shape index: {}]   ;;  %s182_s3 = inlined_call_operand.hbm [shape: f32[8,128], index: 3, kind: output, shape index: {}]  }
   0x1   :  { %9 = vsyncpa [#allocation4], 0  ;;  %s127_s12 = smov [#allocation2]   ;;  %s79_s16 = scalar_lea.hbm %s179_s0, 128 }
   0x2   :  { %s16_s13 = sshll.u32 %s127_s12, 4  ;;  %p80_p0 = scmp.ne.s32.totalorder %s179_s0, %s79_s16  ;;  %s17_s13 = int_to_ptr.vmem [resolvable:$true] %s16_s13 }
   0x3   :  { %p83_p1 = scmp.lt.u32.totalorder %s79_s16, %s179_s0 }
   0x5   :  { %p85_p2 = pnand %p83_p1, %p80_p0 }
   0x7   :  { %88 = shalt.err (!%p85_p2)
}
   0x8   :  { %s89_s21 = scalar_lea.vmem %s17_s13, 128  ;;  %p94_p4 = scmp.lt.s32.totalorder %s17_s13, %s17_s13 }
   0x9   :  { %p90_p3 = scmp.ne.s32.totalorder %s17_s13, %s89_s21  ;;  %p95_p5 = scmp.lt.s32.totalorder %s89_s21, %s89_s21 }
   0xb   :  { %p96_p6 = por %p95_p5, %p94_p4 }
   0xd   :  { %p97_p7 = pnand %p96_p6, %p90_p3 }
   0xf   :  { %100 = shalt.err (!%p97_p7)
}
  0x10   :  { %19 = dma.hbm_to_vmem [thread:$0]  %s179_s0, 128, %s17_s13, [#allocation3]  }
  0x11   :  { %123 = dma.done.wait [#allocation3], 128  }
  0x12   :  { %124 = vsyncadd [#allocation3], 4294967168  ;;  %v27_v0 = vld [vmem:[#allocation2] sm:$0xff]  ;;  %s128_s27 = smov [#allocation5]  }
  0x13   :  { %28 = vadd.xlane.f32.xlu0 %v27_v0  ;;  %v30_v1 = vmul.f32 %v27_v0, %v27_v0  ;;  %v73_v9 = vld [vmem:[%s180_s1] ss:$0 sm:$0xff]  ;;  %s64_s28 = sshll.u32 %s128_s27, 4  ;;  %s65_s28 = int_to_ptr.vmem [resolvable:$true] %s64_s28 }
  0x14   :  { %v74_v13 = vld [vmem:[%s181_s2] ss:$0 sm:$0xff]  ;;  %s101_s29 = scalar_lea.vmem %s65_s28, 128  ;;  %p106_p9 = scmp.lt.s32.totalorder %s65_s28, %s65_s28 }
  0x15   :  { %p102_p8 = scmp.ne.s32.totalorder %s65_s28, %s101_s29  ;;  %p107_p10 = scmp.lt.s32.totalorder %s101_s29, %s101_s29 }
  0x17   :  { %31 = vadd.xlane.f32.xlu0 %v30_v1  ;;  %p108_p11 = por %p107_p10, %p106_p9 }
  0x19   :  { %p109_p12 = pnand %p108_p11, %p102_p8 }
  0xa0   :  { %v29_v2 = vpop.xlane.xlu0 %28 }
  0xa1   :  { %v33_v3 = vmul.f32 0.0078125, %v29_v2 }
  0xa3   :  { %v34_v4 = vmul.f32 %v33_v3, %v29_v2  ;;  %v41_v11 = vsub.f32 %v27_v0, %v33_v3 }
  0xa4   :  { %v32_v5 = vpop.xlane.xlu0 %31 }
  0xa5   :  { %v35_v6 = vsub.f32 %v32_v5, %v34_v4 }
  0xa7   :  { %v36_v7 = vmul.f32 0.007874016, %v35_v6 }
  0xa9   :  { %v37_v8 = vadd.f32 1e-06, %v36_v7 }
  0xab   :  { %77 = vrsqrt.f32 %v37_v8 }
  0xb5   :  { %v78_v10 = vpop.eup %77 }
  0xb6   :  { %v48_v12 = vmul.f32 %v78_v10, %v73_v9 }
  0xb8   :  { %v49_v14 = vmul.f32 %v48_v12, %v41_v11 }
  0xba   :  { %v56_v15 = vadd.f32 %v74_v13, %v49_v14 }
  0xbc   :  { %57 = vst [vmem:[#allocation5] sm:$0xff] %v56_v15 }
  0xbd   :  { %112 = shalt.err (!%p109_p12)
}
  0xbe   :  { %s113_s4 = scalar_lea.hbm %s182_s3, 128 }
  0xbf   :  { %p114_p13 = scmp.ne.s32.totalorder %s182_s3, %s113_s4  ;;  %p117_p0 = scmp.lt.u32.totalorder %s113_s4, %s182_s3 }
  0xc1   :  { %p119_p1 = pnand %p117_p0, %p114_p13 }
  0xc3   :  { %122 = shalt.err (!%p119_p1)
}
  0xc4   :  { %67 = dma.vmem_to_hbm [thread:$0]  %s65_s28, 128, %s182_s3, [#allocation4]  }
  0xc5   :  { %125 = dma.done.wait [#allocation4], 128  }
  0xc6   :  { %126 = vsyncadd [#allocation4], 4294967168 }
  0xc7   :  { %71 = vsyncpa [#allocation3], 1 }
  0xc8   :  { %72 = vsyncpa [#allocation4], 1 }

</bundles_post_ra>
